<compile_context>
chip_gen: v6e
topology: v6e:2x2x1
jax: 0.10.0
libtpu: 0.0.40
codegen_flags: <defaults>
</compile_context>

<pallas_src>
import jax
import jax.numpy as jnp
import numpy as np
from jax import lax
from jax.experimental import pallas as pl
from jax.experimental.pallas import tpu as pltpu


def _actionq_kernel(x_ref, w_ref, b_ref, o_ref):
    # x_ref : (TB, H)  VMEM  activations (input dtype, streamed per grid step)
    # w_ref : (N,  H)  VMEM  nn.Linear weight, natural lane-dense layout (resident)
    # b_ref : (1,  N)  VMEM  bias row (resident)
    # o_ref : (TB, N)  VMEM  q-values tile
    x = x_ref[...]
    w = w_ref[...]
    # Contract over hidden dim of both operands: (TB, H) x (N, H) -> (TB, N), f32 acc.
    acc = lax.dot_general(
        x, w,
        dimension_numbers=(((1,), (1,)), ((), ())),
        preferred_element_type=jnp.float32,
    )
    o_ref[...] = (acc + b_ref[...].astype(jnp.float32)).astype(o_ref.dtype)


def procgen_action_q_forward(state_rep, weight, bias, *, block_b=512):
    """Pallas implementation of ProcGenActionQ.forward.

    state_rep: (B, H) float (f32 or bf16 — passed through as-is, no wrapper cast)
    weight   : (N, H) float (PyTorch nn.Linear weight layout, N = num_actions)
    bias     : (N,)   float
    returns  : (B, N) in state_rep.dtype
    """
    B, H = state_rep.shape
    N, H_w = weight.shape
    assert H_w == H, (weight.shape, state_rep.shape)

    # Batch tile: multiple of 8 sublanes, capped at B (tiny batches -> one full block).
    if B >= 8:
        tb = max(8, (min(block_b, B) // 8) * 8)
    else:
        tb = B
    grid = (pl.cdiv(B, tb),)

    bias_row = bias.reshape(1, N)

    out = pl.pallas_call(
        _actionq_kernel,
        out_shape=jax.ShapeDtypeStruct((B, N), state_rep.dtype),
        grid_spec=pl.GridSpec(
            grid=grid,
            in_specs=[
                pl.BlockSpec((tb, H), lambda i: (i, 0)),   # streamed batch tiles
                pl.BlockSpec((N, H), lambda i: (0, 0)),    # weight resident across steps
                pl.BlockSpec((1, N), lambda i: (0, 0)),    # bias resident across steps
            ],
            out_specs=pl.BlockSpec((tb, N), lambda i: (i, 0)),
        ),
        compiler_params=pltpu.CompilerParams(
            dimension_semantics=("parallel",),  # pure data-parallel batch axis (v7x 2 TCs)
        ),
    )(state_rep, weight, bias_row)
    return out


def init_params(num_actions, hidden_dim, key):
    """Mimics layer_init(nn.Linear(hidden_dim, num_actions), std=1):
    semi-orthogonal (num_actions, hidden_dim) weight with gain 1, bias = 0."""
    raw = jax.random.normal(key, (hidden_dim, num_actions), dtype=jnp.float32)
    q, _ = jnp.linalg.qr(raw)                 # (hidden_dim, num_actions), orthonormal cols
    weight = q.T.astype(jnp.float32)          # (num_actions, hidden_dim), orthonormal rows
    bias = jnp.zeros((num_actions,), dtype=jnp.float32)
    return weight, bias


if __name__ == "__main__":
    batch = 8
    hidden_dim = 32
    num_actions = 15   # ProcGen action space size

    key = jax.random.PRNGKey(0)
    k_x, k_w = jax.random.split(key)

    state_rep = jax.random.normal(k_x, (batch, hidden_dim), dtype=jnp.float32)
    weight, bias = init_params(num_actions, hidden_dim, k_w)

    q_values = procgen_action_q_forward(state_rep, weight, bias)
    q_values = jax.block_until_ready(q_values)

    # Reference check in plain JAX (same math as the PyTorch Linear).
    q_ref = state_rep @ weight.T + bias
    np.testing.assert_allclose(np.asarray(q_values), np.asarray(q_ref),
                               rtol=1e-5, atol=1e-5)
    assert q_values.shape == (batch, num_actions)

    print("KERNEL_OK")
</pallas_src>

<mosaic_0001>
module attributes {stable_mosaic.version = 11 : i64} {
  func.func @_actionq_kernel(%arg0: i32, %arg1: memref<8x32xf32, #tpu.memory_space<vmem>>, %arg2: memref<15x32xf32, #tpu.memory_space<vmem>>, %arg3: memref<1x15xf32, #tpu.memory_space<vmem>>, %arg4: memref<8x15xf32, #tpu.memory_space<vmem>>) attributes {dimension_semantics = [#tpu.dimension_semantics<parallel>], iteration_bounds = array<i64: 1>, scalar_prefetch = 0 : i64, scratch_operands = 0 : i64, tpu.core_type = #tpu.core_type<tc>, window_params = [{transform_indices = @transform_0, window_bounds = array<i64: 8, 32>}, {pipeline_mode = #tpu.pipeline_mode<synchronous>, transform_indices = @transform_1, window_bounds = array<i64: 15, 32>}, {pipeline_mode = #tpu.pipeline_mode<synchronous>, transform_indices = @transform_2, window_bounds = array<i64: 1, 15>}, {transform_indices = @transform_3, window_bounds = array<i64: 8, 15>}]} {
    %c0 = arith.constant 0 : index
    %c0_0 = arith.constant 0 : index
    %0 = vector.load %arg1[%c0, %c0_0] : memref<8x32xf32, #tpu.memory_space<vmem>>, vector<8x32xf32>
    %c0_1 = arith.constant 0 : index
    %c0_2 = arith.constant 0 : index
    %1 = vector.load %arg2[%c0_1, %c0_2] : memref<15x32xf32, #tpu.memory_space<vmem>>, vector<15x32xf32>
    %cst = arith.constant dense<0.000000e+00> : vector<8x15xf32>
    %2 = tpu.matmul %0, %1, %cst {dimension_numbers = #tpu.dot_dimension_numbers<[1], [1], [0], [0], [0, 0, 1, 0], [], []>} : vector<8x32xf32>, vector<15x32xf32>, vector<8x15xf32> -> vector<8x15xf32>
    %c0_3 = arith.constant 0 : index
    %c0_4 = arith.constant 0 : index
    %3 = vector.load %arg3[%c0_3, %c0_4] : memref<1x15xf32, #tpu.memory_space<vmem>>, vector<1x15xf32>
    %4 = vector.broadcast %3 : vector<1x15xf32> to vector<8x15xf32>
    %5 = arith.addf %2, %4 : vector<8x15xf32>
    %c0_5 = arith.constant 0 : index
    %c0_6 = arith.constant 0 : index
    %6 = vector.load %arg4[%c0_5, %c0_6] : memref<8x15xf32, #tpu.memory_space<vmem>>, vector<8x15xf32>
    tpu.vector_store %arg4[%c0_5, %c0_6], %5 {strides = array<i32>} : memref<8x15xf32, #tpu.memory_space<vmem>>, vector<8x15xf32>,
    return
  }
  func.func @transform_0(%arg0: i32) -> (i32, i32) {
    %c0_i32 = arith.constant 0 : i32
    %c0_i32_0 = arith.constant 0 : i32
    return %arg0, %c0_i32 : i32, i32
  }
  func.func @transform_1(%arg0: i32) -> (i32, i32) {
    %c0_i32 = arith.constant 0 : i32
    %c0_i32_0 = arith.constant 0 : i32
    %c0_i32_1 = arith.constant 0 : i32
    return %c0_i32, %c0_i32_0 : i32, i32
  }
  func.func @transform_2(%arg0: i32) -> (i32, i32) {
    %c0_i32 = arith.constant 0 : i32
    %c0_i32_0 = arith.constant 0 : i32
    %c0_i32_1 = arith.constant 0 : i32
    return %c0_i32, %c0_i32_0 : i32, i32
  }
  func.func @transform_3(%arg0: i32) -> (i32, i32) {
    %c0_i32 = arith.constant 0 : i32
    %c0_i32_0 = arith.constant 0 : i32
    return %arg0, %c0_i32 : i32, i32
  }
}

</mosaic_0001>

<bundles_post_ra>
// kernel: tpu_custom_call.1
= control target key start
LH: loop header
LB: loop body
LE: loop exit
PB: predicated region body
PF: predicated region fallthrough
CT: control target
= control target key end

     0   :  { %8 = vsyncpa [#allocation3], 0  ;;  %s275_s0 = inlined_call_operand.hbm [shape: f32[8,32], index: 0, kind: input, shape index: {}]   ;;  %s276_s1 = inlined_call_operand.hbm [shape: f32[15,32], index: 1, kind: input, shape index: {}]   ;;  %s277_s2 = inlined_call_operand.vmem [shape: f32[1,15], index: 2, kind: input, shape index: {}]   ;;  %s278_s3 = inlined_call_operand.hbm [shape: f32[8,15], index: 3, kind: output, shape index: {}]  }
   0x1   :  { %9 = vsyncpa [#allocation6], 0 }
   0x2   :  { %10 = vsyncpa [#allocation4], 0  ;;  %s236_s12 = smov [#allocation2]   ;;  %s237_s14 = smov [#allocation5]  }
   0x3   :  { %s17_s13 = sshll.u32 %s236_s12, 4  ;;  %s26_s15 = sshll.u32 %s237_s14, 4  ;;  %s18_s13 = int_to_ptr.vmem [resolvable:$true] %s17_s13  ;;  %s27_s15 = int_to_ptr.vmem [resolvable:$true] %s26_s15 }
   0x4   :  { %s178_s16 = scalar_lea.vmem %s18_s13, 128  ;;  %p183_p1 = scmp.lt.s32.totalorder %s18_s13, %s18_s13 }
   0x5   :  { %p179_p0 = scmp.ne.s32.totalorder %s18_s13, %s178_s16  ;;  %p184_p2 = scmp.lt.s32.totalorder %s178_s16, %s178_s16 }
   0x7   :  { %p185_p3 = por %p184_p2, %p183_p1 }
   0x9   :  { %p186_p4 = pnand %p185_p3, %p179_p0 }
   0xb   :  { %189 = shalt.err (!%p186_p4)
}
   0xc   :  { %20 = dma.hbm_to_vmem [thread:$0]  %s275_s0, 128, %s18_s13, [#allocation3]  }
   0xd   :  { %s198_s19 = scalar_lea.vmem %s27_s15, 256  ;;  %p203_p6 = scmp.lt.s32.totalorder %s27_s15, %s27_s15 }
   0xe   :  { %p199_p5 = scmp.ne.s32.totalorder %s27_s15, %s198_s19  ;;  %p204_p7 = scmp.lt.s32.totalorder %s198_s19, %s198_s19 }
  0x10   :  { %p205_p8 = por %p204_p7, %p203_p6 }
  0x12   :  { %p206_p9 = pnand %p205_p8, %p199_p5 }
  0x14   :  { %209 = shalt.err (!%p206_p9)
}
  0x15   :  { %s238_s20 = smov 128   ;;  %s239_s21 = smov 8  }
  0x16   :  { %32 = dma.hbm_to_vmem [thread:$0]  %s276_s1, 256, %s27_s15, [#allocation6], %s238_s20, %s238_s20, %s239_s21  }
  0x17   :  { %230 = dma.done.wait [#allocation3], 128  }
  0x18   :  { %231 = vsyncadd [#allocation3], 4294967168 }
  0x19   :  { %232 = dma.done.wait [#allocation6], 256  }
  0x1a   :  { %233 = vsyncadd [#allocation6], 4294967040  ;;  %v240_v0 = vmov 0.0   ;;  %vm241_vm0 = vmmov 0   ;;  %vm51_vm1 = vcmask 261120   ;;  %v42_v2 = vld [vmem:[#allocation5] sm:$0xff] }
  0x1b   :  { %156 = vmatprep.subr.mxu0 %v240_v0  ;;  %160 = vmatprep.mubr.msk.f32.mxu0 %vm241_vm0, %v240_v0  ;;  %v43_v1 = vld [vmem:[#allocation5 + $0x8] sm:$0x7f]  ;;  %v41_v3 = vld [vmem:[#allocation2] sm:$0xff]  ;;  %s242_s1 = smov [#allocation7]   ;;  %vm131_vm2 = vcmask 121856  }
  0x1c   :  { %157 = vmatpush3.xpose.msk.msra.mxu0 %vm51_vm1, %v43_v1  ;;  %v149_v4 = vld [vmem:[%s277_s2] ss:$0 sm:$0xff]  ;;  %s139_s25 = sshll.u32 %s242_s1, 4  ;;  %s140_s25 = int_to_ptr.vmem [resolvable:$true] %s139_s25 }
  0x1d   :  { %158 = vmatprep.subr.mxu0 %v240_v0  ;;  %s210_s26 = scalar_lea.vmem %s140_s25, 128  ;;  %p215_p11 = scmp.lt.s32.totalorder %s140_s25, %s140_s25 }
  0x1e   :  { %p211_p10 = scmp.ne.s32.totalorder %s140_s25, %s210_s26  ;;  %p216_p12 = scmp.lt.s32.totalorder %s210_s26, %s210_s26 }
  0x20   :  { %159 = vmatpush3.xpose.msk.msra.mxu0 %vm51_vm1, %v42_v2  ;;  %p217_p13 = por %p216_p12, %p215_p11 }
  0x22   :  { %p218_p0 = pnand %p217_p13, %p211_p10 }
  0x23   :  { %161 = vmatmul.mubr.msk.f32.vlgmr.msra.gmra.mxu0 %vm51_vm1, %v41_v3 }
  0xe3   :  { %v127_v5 = vpop.f32.mrf.mxu0 }
  0xe4   :  { %v128_v6 = vadd.f32 %v149_v4, %v127_v5 }
  0xe5   :  { %v162_v7 = vpop.f32.mrf.mxu0 }
  0xe6   :  { %132 = vst.msk [vmem:[#allocation7] sm:$0xff] %vm131_vm2, %v128_v6 }
  0xe7   :  { %221 = shalt.err (!%p218_p0)
}
  0xe8   :  { %142 = dma.vmem_to_hbm [thread:$0]  %s140_s25, 128, %s278_s3, [#allocation4]  }
  0xe9   :  { %234 = dma.done.wait [#allocation4], 128  }
  0xea   :  { %235 = vsyncadd [#allocation4], 4294967168 }
  0xeb   :  { %146 = vsyncpa [#allocation3], 1 }
  0xec   :  { %147 = vsyncpa [#allocation6], 1 }
  0xed   :  { %148 = vsyncpa [#allocation4], 1 }

</bundles_post_ra>
